<compile_context>
chip_gen: v7x
topology: tpu7x:2x2x1
jax: 0.10.0
libtpu: 0.0.40
codegen_flags: <defaults>
</compile_context>

<pallas_src>
import functools

import jax
import jax.numpy as jnp
import numpy as np
from jax import lax
from jax.experimental import pallas as pl
from jax.experimental.pallas import tpu as pltpu


# -----------------------------------------------------------------------------
# Kernel (feature-major: batch on the lane axis)
# -----------------------------------------------------------------------------
def _encoder_kernel(xT_ref, w1T_ref, b1T_ref, w2T_ref, b2T_ref,
                    whT_ref, bhT_ref, out_ref):
    """One batch tile:  out^T = [mu^T ; exp(logvar)^T]   shape (2L, tb)."""
    # ---- hidden MLP (Linear -> ReLU) x 2, f32 accumulation ------------------
    # (H1, D) @ (D, tb) -> (H1, tb)
    h = jnp.dot(w1T_ref[...], xT_ref[...],
                preferred_element_type=jnp.float32) + b1T_ref[...]
    h = jnp.maximum(h, 0.0)
    # (H2, H1) @ (H1, tb) -> (H2, tb)
    h = jnp.dot(w2T_ref[...], h.astype(w2T_ref.dtype),
                preferred_element_type=jnp.float32) + b2T_ref[...]
    h = jnp.maximum(h, 0.0)

    # ---- fused latent heads: y^T = [mu^T ; logvar^T]  (2L, tb) --------------
    y = jnp.dot(whT_ref[...], h.astype(whT_ref.dtype),
                preferred_element_type=jnp.float32) + bhT_ref[...]

    # Rows [0, L) are mu; rows [L, 2L) are logvar -> exp (EUP slot, ~free).
    # Single lane-dense store; no slice relayout, no masked vst.
    # (Garbage columns of a partial last batch tile may hit exp(); results are
    #  discarded by the masked output-edge store, so this is benign.)
    L = out_ref.shape[0] // 2
    rows = lax.broadcasted_iota(jnp.int32, y.shape, 0)
    out_ref[...] = jnp.where(rows >= L, jnp.exp(y), y).astype(out_ref.dtype)


# -----------------------------------------------------------------------------
# Parameter preparation (hoisted off the hot path)
# -----------------------------------------------------------------------------
def prepare_encoder_params(params, matmul_dtype=jnp.bfloat16):
    """Fuse the mu/logvar heads, transpose to feature-major, cast matmul
    operands.  Call once at init; the result is what the encoder consumes."""
    cast = (lambda w: w) if matmul_dtype is None else (lambda w: w.astype(matmul_dtype))
    w_heads = jnp.concatenate([params["wmu"], params["wlv"]], axis=1)   # (H2, 2L)
    b_heads = jnp.concatenate([params["bmu"], params["blv"]], axis=1)   # (1, 2L)
    return dict(
        w1T=cast(params["w1"].T),                       # (H1, D)
        b1T=params["b1"].T.astype(jnp.float32),         # (H1, 1)
        w2T=cast(params["w2"].T),                       # (H2, H1)
        b2T=params["b2"].T.astype(jnp.float32),         # (H2, 1)
        whT=cast(w_heads.T),                            # (2L, H2)
        bhT=b_heads.T.astype(jnp.float32),              # (2L, 1)
    )


def diag_embed(var):
    """cov = diag_embed(var). Only build the dense (B, L, L) matrix when a
    downstream consumer genuinely needs MultivariateNormal's full matrix."""
    L = var.shape[-1]
    return var[..., :, None] * jnp.eye(L, dtype=var.dtype)


def _round_up(n, m):
    return ((n + m - 1) // m) * m


# -----------------------------------------------------------------------------
# Wrapper
# -----------------------------------------------------------------------------
@functools.partial(jax.jit, static_argnames=("tile_b",))
def isotropic_gaussian_encoder(x, prep, *, tile_b=4096):
    """x: (B, dim_input) f32. prep: output of prepare_encoder_params().

    Returns (mu: (B, L), var: (B, L)) — the parameters of
    MultivariateNormal(loc=mu, covariance_matrix=diag_embed(var)).
    """
    B, D = x.shape
    H1 = prep["w1T"].shape[0]
    H2 = prep["w2T"].shape[0]
    twoL = prep["whT"].shape[0]
    L = twoL // 2
    mm_dtype = prep["w1T"].dtype

    # Feature-major input: batch on the lane axis.
    xT = x.T.astype(mm_dtype)                                  # (D, B)

    # Batch tile: as large as sensible.  For B > 128 clamp so the grid has at
    # least 2 steps — on v7x that is what lets the "parallel" batch axis feed
    # both TensorCores.  VMEM footprint at tb=4096 is well under 1 MiB, far
    # from the 64 MiB (v7x) / 128 MiB (v5e/v6e) limits.
    if B <= 128:
        tb = B                      # single full-extent block (lane dim == B)
    else:
        tb = max(128, min(tile_b, _round_up((B + 1) // 2, 128)))
    grid = (pl.cdiv(B, tb),)

    resident = lambda shape: pl.BlockSpec(shape, lambda i: (0, 0))

    itemsize = jnp.dtype(mm_dtype).itemsize
    cost = pl.CostEstimate(
        flops=2 * B * (D * H1 + H1 * H2 + H2 * twoL),
        transcendentals=B * twoL,
        bytes_accessed=(itemsize * (B * D + D * H1 + H1 * H2 + H2 * twoL)
                        + 4 * (H1 + H2 + twoL)
                        + 4 * B * twoL),
    )

    out = pl.pallas_call(
        _encoder_kernel,
        grid=grid,
        in_specs=[
            pl.BlockSpec((D, tb), lambda i: (0, i)),   # x^T : tiled over batch
            resident((H1, D)),                          # W1^T
            resident((H1, 1)),                          # b1^T
            resident((H2, H1)),                         # W2^T
            resident((H2, 1)),                          # b2^T
            resident((twoL, H2)),                       # [Wmu|Wlv]^T
            resident((twoL, 1)),                        # [bmu|blv]^T
        ],
        out_specs=pl.BlockSpec((twoL, tb), lambda i: (0, i)),
        out_shape=jax.ShapeDtypeStruct((twoL, B), jnp.float32),
        compiler_params=pltpu.CompilerParams(
            dimension_semantics=("parallel",)),
        cost_estimate=cost,
    )(xT, prep["w1T"], prep["b1T"], prep["w2T"], prep["b2T"],
      prep["whT"], prep["bhT"])

    y = out.T                                                   # (B, 2L)
    mu = y[:, :L]
    var = y[:, L:]
    return mu, var


# -----------------------------------------------------------------------------
# Parameters + reference
# -----------------------------------------------------------------------------
def _init_params(key, dim_input, dims_hidden, dim_latent):
    """Deterministic synthetic parameter init (Kaiming-ish uniform).
    Weights stored (in, out) so the reference computes y = x @ W + b."""
    def linear(k, fan_in, fan_out):
        kw, kb = jax.random.split(k)
        bound = 1.0 / np.sqrt(fan_in)
        w = jax.random.uniform(kw, (fan_in, fan_out), jnp.float32, -bound, bound)
        b = jax.random.uniform(kb, (1, fan_out), jnp.float32, -bound, bound)
        return w, b

    k1, k2, k3, k4 = jax.random.split(key, 4)
    w1, b1 = linear(k1, dim_input, dims_hidden[0])
    w2, b2 = linear(k2, dims_hidden[0], dims_hidden[1])
    wmu, bmu = linear(k3, dims_hidden[1], dim_latent)
    wlv, blv = linear(k4, dims_hidden[1], dim_latent)
    return dict(w1=w1, b1=b1, w2=w2, b2=b2,
                wmu=wmu, bmu=bmu, wlv=wlv, blv=blv)


def _reference(x, p):
    h = jnp.maximum(x @ p["w1"] + p["b1"], 0.0)
    h = jnp.maximum(h @ p["w2"] + p["b2"], 0.0)
    mu = h @ p["wmu"] + p["bmu"]
    lv = h @ p["wlv"] + p["blv"]
    return mu, jnp.exp(lv)


# -----------------------------------------------------------------------------
# Main
# -----------------------------------------------------------------------------
if __name__ == "__main__":
    DIM_INPUT, DIMS_HIDDEN, DIM_LATENT = 16, (32, 32), 8

    key = jax.random.PRNGKey(0)
    kx1, kx2, kp = jax.random.split(key, 3)
    params = _init_params(kp, DIM_INPUT, DIMS_HIDDEN, DIM_LATENT)

    # ---- f32 operands: exact check (single tile, B <= 128) ------------------
    prep_f32 = prepare_encoder_params(params, matmul_dtype=None)
    x_small = jax.random.normal(kx1, (8, DIM_INPUT), jnp.float32)
    mu, var = isotropic_gaussian_encoder(x_small, prep_f32)
    jax.block_until_ready((mu, var))
    mu_ref, var_ref = _reference(x_small, params)
    np.testing.assert_allclose(np.asarray(mu), np.asarray(mu_ref), rtol=1e-5, atol=1e-5)
    np.testing.assert_allclose(np.asarray(var), np.asarray(var_ref), rtol=1e-5, atol=1e-5)
    # Dense covariance (torch.diag_embed equivalent), built only on demand.
    cov = diag_embed(var)
    cov_ref = jax.vmap(jnp.diag)(var_ref)
    np.testing.assert_allclose(np.asarray(cov), np.asarray(cov_ref), rtol=1e-5, atol=1e-5)

    # ---- default bf16 operands: multi-step batch grid, partial last tile ----
    # (bf16 matmul operands => looser tolerance; accumulation/exp remain f32.)
    prep_bf16 = prepare_encoder_params(params)          # bf16 by default
    x_big = jax.random.normal(kx2, (200, DIM_INPUT), jnp.float32)
    mu2, var2 = isotropic_gaussian_encoder(x_big, prep_bf16)
    jax.block_until_ready((mu2, var2))
    mu2_ref, var2_ref = _reference(x_big, params)
    np.testing.assert_allclose(np.asarray(mu2), np.asarray(mu2_ref), rtol=3e-2, atol=3e-2)
    np.testing.assert_allclose(np.asarray(var2), np.asarray(var2_ref), rtol=3e-2, atol=3e-2)

    print("KERNEL_OK")
</pallas_src>

<mosaic_0001>
module attributes {stable_mosaic.version = 11 : i64} {
  func.func @_encoder_kernel(%arg0: i32, %arg1: memref<16x8xf32, #tpu.memory_space<vmem>>, %arg2: memref<32x16xf32, #tpu.memory_space<vmem>>, %arg3: memref<32x1xf32, #tpu.memory_space<vmem>>, %arg4: memref<32x32xf32, #tpu.memory_space<vmem>>, %arg5: memref<32x1xf32, #tpu.memory_space<vmem>>, %arg6: memref<16x32xf32, #tpu.memory_space<vmem>>, %arg7: memref<16x1xf32, #tpu.memory_space<vmem>>, %arg8: memref<16x8xf32, #tpu.memory_space<vmem>>) attributes {dimension_semantics = [#tpu.dimension_semantics<parallel>], iteration_bounds = array<i64: 1>, scalar_prefetch = 0 : i64, scratch_operands = 0 : i64, tpu.core_type = #tpu.core_type<tc>, window_params = [{transform_indices = @transform_0, window_bounds = array<i64: 16, 8>}, {pipeline_mode = #tpu.pipeline_mode<synchronous>, transform_indices = @transform_1, window_bounds = array<i64: 32, 16>}, {pipeline_mode = #tpu.pipeline_mode<synchronous>, transform_indices = @transform_2, window_bounds = array<i64: 32, 1>}, {pipeline_mode = #tpu.pipeline_mode<synchronous>, transform_indices = @transform_3, window_bounds = array<i64: 32, 32>}, {pipeline_mode = #tpu.pipeline_mode<synchronous>, transform_indices = @transform_4, window_bounds = array<i64: 32, 1>}, {pipeline_mode = #tpu.pipeline_mode<synchronous>, transform_indices = @transform_5, window_bounds = array<i64: 16, 32>}, {pipeline_mode = #tpu.pipeline_mode<synchronous>, transform_indices = @transform_6, window_bounds = array<i64: 16, 1>}, {transform_indices = @transform_7, window_bounds = array<i64: 16, 8>}]} {
    %c0 = arith.constant 0 : index
    %c0_0 = arith.constant 0 : index
    %0 = vector.load %arg2[%c0, %c0_0] : memref<32x16xf32, #tpu.memory_space<vmem>>, vector<32x16xf32>
    %c0_1 = arith.constant 0 : index
    %c0_2 = arith.constant 0 : index
    %1 = vector.load %arg1[%c0_1, %c0_2] : memref<16x8xf32, #tpu.memory_space<vmem>>, vector<16x8xf32>
    %cst = arith.constant dense<0.000000e+00> : vector<32x8xf32>
    %2 = tpu.matmul %0, %1, %cst {dimension_numbers = #tpu.dot_dimension_numbers<[1], [0], [0], [1], [0, 0, 1, 1], [], []>} : vector<32x16xf32>, vector<16x8xf32>, vector<32x8xf32> -> vector<32x8xf32>
    %c0_3 = arith.constant 0 : index
    %c0_4 = arith.constant 0 : index
    %3 = vector.load %arg3[%c0_3, %c0_4] : memref<32x1xf32, #tpu.memory_space<vmem>>, vector<32x1xf32>
    %4 = vector.broadcast %3 : vector<32x1xf32> to vector<32x8xf32>
    %5 = arith.addf %2, %4 : vector<32x8xf32>
    %cst_5 = arith.constant 0.000000e+00 : f32
    %6 = vector.broadcast %cst_5 : f32 to vector<32x8xf32>
    %7 = arith.maximumf %5, %6 : vector<32x8xf32>
    %c0_6 = arith.constant 0 : index
    %c0_7 = arith.constant 0 : index
    %8 = vector.load %arg4[%c0_6, %c0_7] : memref<32x32xf32, #tpu.memory_space<vmem>>, vector<32x32xf32>
    %cst_8 = arith.constant dense<0.000000e+00> : vector<32x8xf32>
    %9 = tpu.matmul %8, %7, %cst_8 {dimension_numbers = #tpu.dot_dimension_numbers<[1], [0], [0], [1], [0, 0, 1, 1], [], []>} : vector<32x32xf32>, vector<32x8xf32>, vector<32x8xf32> -> vector<32x8xf32>
    %c0_9 = arith.constant 0 : index
    %c0_10 = arith.constant 0 : index
    %10 = vector.load %arg5[%c0_9, %c0_10] : memref<32x1xf32, #tpu.memory_space<vmem>>, vector<32x1xf32>
    %11 = vector.broadcast %10 : vector<32x1xf32> to vector<32x8xf32>
    %12 = arith.addf %9, %11 : vector<32x8xf32>
    %cst_11 = arith.constant 0.000000e+00 : f32
    %13 = vector.broadcast %cst_11 : f32 to vector<32x8xf32>
    %14 = arith.maximumf %12, %13 : vector<32x8xf32>
    %c0_12 = arith.constant 0 : index
    %c0_13 = arith.constant 0 : index
    %15 = vector.load %arg6[%c0_12, %c0_13] : memref<16x32xf32, #tpu.memory_space<vmem>>, vector<16x32xf32>
    %cst_14 = arith.constant dense<0.000000e+00> : vector<16x8xf32>
    %16 = tpu.matmul %15, %14, %cst_14 {dimension_numbers = #tpu.dot_dimension_numbers<[1], [0], [0], [1], [0, 0, 1, 1], [], []>} : vector<16x32xf32>, vector<32x8xf32>, vector<16x8xf32> -> vector<16x8xf32>
    %c0_15 = arith.constant 0 : index
    %c0_16 = arith.constant 0 : index
    %17 = vector.load %arg7[%c0_15, %c0_16] : memref<16x1xf32, #tpu.memory_space<vmem>>, vector<16x1xf32>
    %18 = vector.broadcast %17 : vector<16x1xf32> to vector<16x8xf32>
    %19 = arith.addf %16, %18 : vector<16x8xf32>
    %20 = tpu.iota {dimensions = array<i32: 0>} : vector<16x8xi32>
    %c8_i32 = arith.constant 8 : i32
    %21 = vector.broadcast %c8_i32 : i32 to vector<16x8xi32>
    %22 = arith.cmpi sge, %20, %21 : vector<16x8xi32>
    %23 = math.exp %19 : vector<16x8xf32>
    %24 = arith.select %22, %23, %19 : vector<16x8xi1>, vector<16x8xf32>
    %c0_17 = arith.constant 0 : index
    %c0_18 = arith.constant 0 : index
    %25 = vector.load %arg8[%c0_17, %c0_18] : memref<16x8xf32, #tpu.memory_space<vmem>>, vector<16x8xf32>
    tpu.vector_store %arg8[%c0_17, %c0_18], %24 {strides = array<i32>} : memref<16x8xf32, #tpu.memory_space<vmem>>, vector<16x8xf32>,
    return
  }
  func.func @transform_0(%arg0: i32) -> (i32, i32) {
    %c0_i32 = arith.constant 0 : i32
    %c0_i32_0 = arith.constant 0 : i32
    return %c0_i32, %arg0 : i32, i32
  }
  func.func @transform_1(%arg0: i32) -> (i32, i32) {
    %c0_i32 = arith.constant 0 : i32
    %c0_i32_0 = arith.constant 0 : i32
    %c0_i32_1 = arith.constant 0 : i32
    return %c0_i32, %c0_i32_0 : i32, i32
  }
  func.func @transform_2(%arg0: i32) -> (i32, i32) {
    %c0_i32 = arith.constant 0 : i32
    %c0_i32_0 = arith.constant 0 : i32
    %c0_i32_1 = arith.constant 0 : i32
    return %c0_i32, %c0_i32_0 : i32, i32
  }
  func.func @transform_3(%arg0: i32) -> (i32, i32) {
    %c0_i32 = arith.constant 0 : i32
    %c0_i32_0 = arith.constant 0 : i32
    %c0_i32_1 = arith.constant 0 : i32
    return %c0_i32, %c0_i32_0 : i32, i32
  }
  func.func @transform_4(%arg0: i32) -> (i32, i32) {
    %c0_i32 = arith.constant 0 : i32
    %c0_i32_0 = arith.constant 0 : i32
    %c0_i32_1 = arith.constant 0 : i32
    return %c0_i32, %c0_i32_0 : i32, i32
  }
  func.func @transform_5(%arg0: i32) -> (i32, i32) {
    %c0_i32 = arith.constant 0 : i32
    %c0_i32_0 = arith.constant 0 : i32
    %c0_i32_1 = arith.constant 0 : i32
    return %c0_i32, %c0_i32_0 : i32, i32
  }
  func.func @transform_6(%arg0: i32) -> (i32, i32) {
    %c0_i32 = arith.constant 0 : i32
    %c0_i32_0 = arith.constant 0 : i32
    %c0_i32_1 = arith.constant 0 : i32
    return %c0_i32, %c0_i32_0 : i32, i32
  }
  func.func @transform_7(%arg0: i32) -> (i32, i32) {
    %c0_i32 = arith.constant 0 : i32
    %c0_i32_0 = arith.constant 0 : i32
    return %c0_i32, %arg0 : i32, i32
  }
}

</mosaic_0001>

<bundles_post_ra>
// kernel: isotropic_gaussian_encoder.1
= control target key start
LH: loop header
LB: loop body
LE: loop exit
PB: predicated region body
PF: predicated region fallthrough
CT: control target
= control target key end

     0   :  { %vm56_vm0 = vcmask 130048   ;;  %v491_v3 = vmov 0   ;;  %vm186_vm1 = vcmask 261120   ;;  %vm394_vm2 = vcmask 64512   ;;  %s614_s0 = inlined_call_operand.vmem [shape: f32[16,8], index: 0, kind: input, shape index: {}]   ;;  %s615_s1 = inlined_call_operand.vmem [shape: f32[32,16], index: 1, kind: input, shape index: {}]   ;;  %s616_s2 = inlined_call_operand.vmem [shape: f32[32,1], index: 2, kind: input, shape index: {}]   ;;  %s617_s4 = inlined_call_operand.vmem [shape: f32[32,1], index: 4, kind: input, shape index: {}]   ;;  %s618_s6 = inlined_call_operand.vmem [shape: f32[16,1], index: 6, kind: input, shape index: {}]   ;;  %s619_s3 = inlined_call_operand.vmem [shape: f32[32,32], index: 3, kind: input, shape index: {}]   ;;  %s620_s5 = inlined_call_operand.vmem [shape: f32[16,32], index: 5, kind: input, shape index: {}]   ;;  %s621_s7 = inlined_call_operand.vmem [shape: f32[16,8], index: 7, kind: output, shape index: {}]  }
   0x1   :  { %v30_v0 = vld [vmem:[%s614_s0] sm:$0xff]  ;;  %v31_v1 = vld [vmem:[%s614_s0 + $0x8] sm:$0xff]  ;;  %487 = vset.pattern.permute.xlu0 %v491_v3  ;;  %488 = vset.pattern.permute.xlu1 %v491_v3  ;;  %v34_v6 = vld [vmem:[%s616_s2 + $0x10] sm:$0xff] }
   0x2   :  { %v26_v2 = vld [vmem:[%s615_s1] sm:$0xff]  ;;  %v466_v4 = vpack.c.bf16 %v31_v1, %v30_v0  ;;  %v27_v7 = vld [vmem:[%s615_s1 + $0x8] sm:$0xff]  ;;  %48 = vperm.xlu1 %488, %v34_v6   ;;  %v28_v9 = vld [vmem:[%s615_s1 + $0x10] sm:$0xff] }
   0x3   :  { %435 = vmatprep.mubr.msk.f32.mxu0 %vm56_vm0, %v26_v2  ;;  %v32_v5 = vld [vmem:[%s616_s2] sm:$0xff]  ;;  %v33_v8 = vld [vmem:[%s616_s2 + $0x8] sm:$0xff]  ;;  %v35_v10 = vld [vmem:[%s616_s2 + $0x18] sm:$0xff] }
   0x4   :  { %467 = vmatprep.subr.bf16.mxu0 %v466_v4  ;;  %38 = vperm.xlu0 %487, %v32_v5   ;;  %v29_v11 = vld [vmem:[%s615_s1 + $0x18] sm:$0xff]  ;;  %v162_v12 = vld [vmem:[%s617_s4] sm:$0xff]  ;;  %v163_v13 = vld [vmem:[%s617_s4 + $0x8] sm:$0xff] }
   0x5   :  { %469 = vmatpush3.bf16.msra.mxu0 %v466_v4  ;;  %v164_v14 = vld [vmem:[%s617_s4 + $0x10] sm:$0xff]  ;;  %v165_v15 = vld [vmem:[%s617_s4 + $0x18] sm:$0xff]  ;;  %v291_v16 = vld [vmem:[%s618_s6 + $0x8] sm:$0xff] }
   0x6   :  { %53 = vperm.xlu1 %488, %v35_v10   ;;  %v290_v17 = vld [vmem:[%s618_s6] sm:$0xff]  ;;  %v159_v37 = vld [vmem:[%s619_s3 + $0x8] sm:$0xff]  ;;  %v160_v38 = vld [vmem:[%s619_s3 + $0x10] sm:$0xff] }
   0x7   :  { %v158_v18 = vld [vmem:[%s619_s3] sm:$0xff]  ;;  %v161_v39 = vld [vmem:[%s619_s3 + $0x18] sm:$0xff]  ;;  %v289_v59 = vld [vmem:[%s620_s5 + $0x8] sm:$0xff] }
   0x8   :  { %436 = vmatmul.mubr.msk.f32.vlgmr.msra.gmra.mrb[0].mxu0 %vm56_vm0, %v27_v7  ;;  %43 = vperm.xlu0 %487, %v33_v8   ;;  %v288_v40 = vld [vmem:[%s620_s5] sm:$0xff] }
   0x9   :  { %438 = vmatprep.mubr.msk.f32.mxu0 %vm56_vm0, %v28_v9  ;;  %449 = vmatprep.mubr.msk.f32.mxu1 %vm186_vm1, %v158_v18 }
   0xa   :  { %173 = vperm.xlu1 %488, %v163_v13  }
   0xc   :  { %439 = vmatmul.mubr.msk.f32.gmra.mrb[2].mxu0 %vm56_vm0, %v29_v11  ;;  %168 = vperm.xlu0 %487, %v162_v12  }
   0xd   :  { %463 = vmatprep.mubr.msk.f32.mxu0 %vm186_vm1, %v288_v40 }
   0xe   :  { %183 = vperm.xlu1 %488, %v165_v15  }
  0x10   :  { %178 = vperm.xlu0 %487, %v164_v14  }
  0x12   :  { %294 = vperm.xlu1 %488, %v290_v17  }
  0x14   :  { %299 = vperm.xlu0 %487, %v291_v16  }
  0x81   :  { %v49_v20 = vpop.permute.xlu1 %48 }
  0x83   :  { %v39_v19 = vpop.permute.xlu0 %38 }
  0x85   :  { %v54_v27 = vpop.permute.xlu1 %53 }
  0x87   :  { %v44_v21 = vpop.permute.xlu0 %43 }
  0x89   :  { %v174_v41 = vpop.permute.xlu1 %173 }
  0x8b   :  { %v169_v42 = vpop.permute.xlu0 %168 }
  0x8d   :  { %v184_v48 = vpop.permute.xlu1 %183 }
  0x8f   :  { %v179_v51 = vpop.permute.xlu0 %178 }
  0x91   :  { %v295_v62 = vpop.permute.xlu1 %294 }
  0x93   :  { %v300_v60 = vpop.permute.xlu0 %299 }
  0xdb   :  { %v437_v22 = vpop.f32.mrb[0].mxu0 }
  0xdc   :  { %v141_v23 = vadd.f32 %v437_v22, %v44_v21  ;;  %v135_v24 = vpop.f32.mrb[1].mxu0 }
  0xdd   :  { %v136_v25 = vadd.f32 %v135_v24, %v39_v19 }
  0xde   :  { %v155_v26 = vmax.f32 %v141_v23, 0.0 }
  0xdf   :  { %v154_v28 = vmax.f32 %v136_v25, 0.0  ;;  %v440_v29 = vpop.f32.mrb[2].mxu0 }
  0xe0   :  { %v151_v30 = vadd.f32 %v440_v29, %v54_v27  ;;  %v145_v31 = vpop.f32.mrb[3].mxu0 }
  0xe1   :  { %v146_v32 = vadd.f32 %v145_v31, %v49_v20  ;;  %v470_v33 = vpack.c.bf16 %v155_v26, %v154_v28 }
  0xe2   :  { %v157_v34 = vmax.f32 %v151_v30, 0.0 }
  0xe3   :  { %v156_v35 = vmax.f32 %v146_v32, 0.0  ;;  %471 = vmatprep.subr.bf16.mxu1 %v470_v33 }
  0xe4   :  { %473 = vmatpush3.bf16.msra.mxu1 %v470_v33 }
  0xe5   :  { %v474_v36 = vpack.c.bf16 %v157_v34, %v156_v35 }
  0xe7   :  { %475 = vmatprep.subr.bf16.mxu1 %v474_v36 }
  0xe8   :  { %477 = vmatpush3.bf16.msra.mxu1 %v474_v36 }
  0xeb   :  { %450 = vmatmul.mubr.msk.f32.vlgmr.msra.gmra.mrb[0].mxu1 %vm186_vm1, %v159_v37 }
  0xec   :  { %452 = vmatprep.mubr.msk.f32.mxu1 %vm186_vm1, %v160_v38 }
  0xef   :  { %453 = vmatmul.mubr.msk.f32.gmra.mrb[2].mxu1 %vm186_vm1, %v161_v39 }
 0x1be   :  { %v451_v43 = vpop.f32.mrb[0].mxu1 }
 0x1bf   :  { %v271_v44 = vadd.f32 %v451_v43, %v174_v41  ;;  %v265_v45 = vpop.f32.mrb[1].mxu1 }
 0x1c0   :  { %v266_v46 = vadd.f32 %v265_v45, %v169_v42 }
 0x1c1   :  { %v285_v47 = vmax.f32 %v271_v44, 0.0 }
 0x1c2   :  { %v284_v49 = vmax.f32 %v266_v46, 0.0  ;;  %v454_v50 = vpop.f32.mrb[2].mxu1 }
 0x1c3   :  { %v281_v52 = vadd.f32 %v454_v50, %v184_v48  ;;  %v275_v53 = vpop.f32.mrb[3].mxu1 }
 0x1c4   :  { %v478_v54 = vpack.c.bf16 %v285_v47, %v284_v49  ;;  %v276_v55 = vadd.f32 %v275_v53, %v179_v51 }
 0x1c5   :  { %v287_v56 = vmax.f32 %v281_v52, 0.0 }
 0x1c6   :  { %v286_v57 = vmax.f32 %v276_v55, 0.0  ;;  %479 = vmatprep.subr.bf16.mxu0 %v478_v54 }
 0x1c7   :  { %481 = vmatpush3.bf16.msra.mxu0 %v478_v54 }
 0x1c8   :  { %v482_v58 = vpack.c.bf16 %v287_v56, %v286_v57 }
 0x1ca   :  { %483 = vmatprep.subr.bf16.mxu0 %v482_v58 }
 0x1cb   :  { %485 = vmatpush3.bf16.msra.mxu0 %v482_v58 }
 0x1ce   :  { %464 = vmatmul.mubr.msk.f32.vlgmr.msra.gmra.mrb[4].mxu0 %vm186_vm1, %v289_v59 }
 0x2a1   :  { %v465_v61 = vpop.f32.mrb[4].mxu0 }
 0x2a2   :  { %v380_v63 = vadd.f32 %v465_v61, %v300_v60  ;;  %v374_v0 = vpop.f32.mrb[5].mxu0 }
 0x2a3   :  { %v375_v1 = vadd.f32 %v374_v0, %v295_v62 }
 0x2a4   :  { %v390_v2 = vmul.f32 1.442695, %v380_v63 }
 0x2a5   :  { %395 = vst.msk [vmem:[%s621_s7] sm:$0xff] %vm394_vm2, %v375_v1 }
 0x2a6   :  { %489 = vpow2.f32 %v390_v2 }
 0x2b0   :  { %v490_v3 = vpop.eup %489 }
 0x2b1   :  { %396 = vst.msk [vmem:[%s621_s7 + $0x8] sm:$0xff] %vm394_vm2, %v490_v3 }

</bundles_post_ra>
